<compile_context>
chip_gen: v7x
topology: tpu7x:2x2x1
jax: 0.10.0
libtpu: 0.0.40
codegen_flags: <defaults>
</compile_context>

<pallas_src>
import functools
import math

import jax
import jax.numpy as jnp
from jax import lax
from jax.experimental import pallas as pl
from jax.experimental.pallas import tpu as pltpu


_NEG_LARGE = -1e30  # finite stand-in for -inf (avoids inf-inf NaN in the recurrence)


def _softmax_loss_kernel(x_ref, w_ref, y_ref, out_ref,
                         m_sc, l_sc, p_sc, *, pad_cols):
    k = pl.program_id(1)

    @pl.when(k == 0)
    def _():
        m_sc[...] = jnp.full_like(m_sc, _NEG_LARGE)
        l_sc[...] = jnp.zeros_like(l_sc)
        p_sc[...] = jnp.zeros_like(p_sc)

    # logits tile on the MXU: (TN, D) @ (D, TC) -> (TN, TC), f32 accumulation.
    logits = lax.dot_general(
        x_ref[...], w_ref[...], (((1,), (0,)), ((), ())),
        preferred_element_type=jnp.float32)

    tn, tc = logits.shape

    # Tile-local column iota compared against locally-shifted labels: the shift
    # is a (tn, 1) scalar-ish op instead of a (tn, tc) add, and there is no
    # class-padding mask at all (pad W^T columns are zero -> pad logits are
    # exactly 0, corrected for at finalize).
    col = lax.broadcasted_iota(jnp.int32, (tn, tc), 1)
    y_local = y_ref[...] - k * tc                               # (TN, 1) i32
    p_sc[...] += jnp.sum(jnp.where(col == y_local, logits, 0.0),
                         axis=1, keepdims=True)

    # online softmax (running max / running sum-exp)
    m_prev = m_sc[...]
    m_new = jnp.maximum(m_prev, jnp.max(logits, axis=1, keepdims=True))
    alpha = jnp.exp(m_prev - m_new)
    l_sc[...] = alpha * l_sc[...] + jnp.sum(jnp.exp(logits - m_new),
                                            axis=1, keepdims=True)
    m_sc[...] = m_new

    @pl.when(k == pl.num_programs(1) - 1)
    def _():
        m = m_sc[...]
        l = l_sc[...]
        if pad_cols:  # static: only emitted when C was padded up to a TC multiple
            # Padded classes contributed exactly pad_cols * exp(0 - m) to l
            # (their logits are exactly 0 because the pad W^T columns are 0).
            l = jnp.maximum(l - pad_cols * jnp.exp(-m), 1e-30)
        # per-row NLL: lse - logit[y] = m + log(l) - picked
        out_ref[...] = m + jnp.log(l) - p_sc[...]


def _round_up(v, m):
    return (v + m - 1) // m * m


def _vmem_estimate(tn, tc, d, in_bytes):
    """Rough VMEM footprint of the pipelined tile plan (bytes)."""
    return (2 * tn * d * in_bytes        # x tile, double-buffered
            + 2 * d * tc * in_bytes      # W^T tile, double-buffered
            + 2 * tn * 4                 # per-row loss output, double-buffered
            + 3 * tn * 4                 # m / l / p scratch
            + 4 * tn * tc * 4)           # f32 logits + elementwise temporaries


def softmax_loss(x, w, y, *, block_n=1024, block_c=1024,
                 mxu_dtype=jnp.bfloat16, w_transposed=False,
                 vmem_cap_bytes=56 * 1024 * 1024):
    """x: (N, D), w: (C, D) nn.Linear layout (or (D, C) if w_transposed),
    y: (N,) int -> scalar mean NLL loss."""
    n, d = x.shape
    c = w.shape[1] if w_transposed else w.shape[0]

    # Cast BEFORE any transpose/pad so the standalone relayout of W moves half
    # the bytes through HBM.  All accumulation / softmax math stays f32.
    if mxu_dtype is not None:
        x = x.astype(mxu_dtype)
        w = w.astype(mxu_dtype)
    in_bytes = jnp.dtype(x.dtype).itemsize
    sub = 16 if in_bytes == 2 else 8          # native sublane packing multiple

    tn = min(block_n, _round_up(n, sub))
    tc = min(block_c, _round_up(c, 128))

    # Megacore (v7x): if the whole batch would land in one tile but is large
    # enough to split, use two parallel batch tiles so both TensorCores work.
    if n > tn or (n <= tn and n >= 512):
        if _round_up(n, tn) // tn == 1 and n >= 512:
            tn = _round_up(_round_up(n, 2) // 2, sub)

    # VMEM working-set guard (v7x has 64 MiB/TC): shrink tc, then tn, until the
    # double-buffered tile plan fits a conservative budget.
    budget = 48 * 1024 * 1024
    while _vmem_estimate(tn, tc, d, in_bytes) > budget and tc > 128:
        tc = max(128, _round_up(tc // 2, 128))
    while _vmem_estimate(tn, tc, d, in_bytes) > budget and tn > sub:
        tn = max(sub, _round_up(tn // 2, sub))

    n_pad = _round_up(n, tn)
    c_pad = _round_up(c, tc)
    pad_cols = c_pad - c

    # W^T in (D, C): natural (M,K)x(K,N) MXU shape, classes lane-dense.
    w_t = w if w_transposed else jnp.transpose(w)               # (D, C)
    if pad_cols:
        w_t = jnp.pad(w_t, ((0, 0), (0, pad_cols)))             # zero pad (exact)
    if n_pad != n:
        x = jnp.pad(x, ((0, n_pad - n), (0, 0)))
    # padded rows get label -1 -> never match any class, sliced out of the mean
    y2 = jnp.full((n_pad, 1), -1, jnp.int32).at[:n, 0].set(y.astype(jnp.int32))

    grid = (n_pad // tn, c_pad // tc)
    kernel = functools.partial(_softmax_loss_kernel, pad_cols=pad_cols)

    # Scoped-VMEM limit derived from the actual tile plan, capped for v7x.
    vmem_limit = min(vmem_cap_bytes,
                     max(32 * 1024 * 1024,
                         int(1.25 * _vmem_estimate(tn, tc, d, in_bytes))))

    row_loss = pl.pallas_call(
        kernel,
        out_shape=jax.ShapeDtypeStruct((n_pad, 1), jnp.float32),
        grid_spec=pltpu.PrefetchScalarGridSpec(
            num_scalar_prefetch=0,
            grid=grid,
            in_specs=[
                pl.BlockSpec((tn, d), lambda i, k: (i, 0)),        # x tile
                pl.BlockSpec((d, tc), lambda i, k: (0, k)),        # W^T tile
                pl.BlockSpec((tn, 1), lambda i, k: (i, 0)),        # labels
            ],
            out_specs=pl.BlockSpec((tn, 1), lambda i, k: (i, 0)),  # per-row loss
            scratch_shapes=[pltpu.VMEM((tn, 1), jnp.float32),      # running max
                            pltpu.VMEM((tn, 1), jnp.float32),      # running sum-exp
                            pltpu.VMEM((tn, 1), jnp.float32)],     # picked logit
        ),
        compiler_params=pltpu.CompilerParams(
            dimension_semantics=("parallel", "arbitrary"),
            vmem_limit_bytes=vmem_limit,
        ),
    )(x, w_t, y2)

    return jnp.mean(row_loss[:n, 0])


def init_weight(key, input_size, output_size):
    # Mirrors nn.init.kaiming_uniform_(weight, a=0.25):
    #   gain  = sqrt(2 / (1 + a^2)); bound = gain * sqrt(3 / fan_in)
    a = 0.25
    fan_in = input_size
    gain = math.sqrt(2.0 / (1.0 + a * a))
    bound = gain * math.sqrt(3.0 / fan_in)
    return jax.random.uniform(
        key, (output_size, input_size), jnp.float32, minval=-bound, maxval=bound)


def reference_loss(x, w, y):
    logits = x @ w.T
    logprob = jax.nn.log_softmax(logits, axis=1)
    return -jnp.mean(logprob[jnp.arange(x.shape[0]), y])


if __name__ == "__main__":
    key = jax.random.PRNGKey(0)
    k_w, k_x, k_y = jax.random.split(key, 3)

    batch, input_size, output_size = 8, 32, 16

    w = init_weight(k_w, input_size, output_size)                    # (16, 32)
    x = jax.random.normal(k_x, (batch, input_size), jnp.float32)     # (8, 32)
    y = jax.random.randint(k_y, (batch,), 0, output_size, jnp.int32)

    ref = reference_loss(x, w, y)

    # bf16 MXU default path (v5e/v6e/v7x fast path; f32 accumulation & softmax math)
    loss_bf16 = jax.block_until_ready(softmax_loss(x, w, y))
    assert jnp.allclose(loss_bf16, ref, atol=5e-2, rtol=5e-2), (loss_bf16, ref)

    # f32 MXU path (exact against reference)
    loss_f32 = jax.block_until_ready(softmax_loss(x, w, y, mxu_dtype=None))
    assert jnp.allclose(loss_f32, ref, atol=1e-5, rtol=1e-5), (loss_f32, ref)

    print("KERNEL_OK")
</pallas_src>

<mosaic_0001>
module attributes {stable_mosaic.version = 11 : i64} {
  func.func @_softmax_loss_kernel(%arg0: i32, %arg1: i32, %arg2: memref<16x32xbf16, #tpu.memory_space<vmem>>, %arg3: memref<32x128xbf16, #tpu.memory_space<vmem>>, %arg4: memref<16x1xi32, #tpu.memory_space<vmem>>, %arg5: memref<16x1xf32, #tpu.memory_space<vmem>>, %arg6: memref<16x1xf32, #tpu.memory_space<vmem>>, %arg7: memref<16x1xf32, #tpu.memory_space<vmem>>, %arg8: memref<16x1xf32, #tpu.memory_space<vmem>>) attributes {dimension_semantics = [#tpu.dimension_semantics<parallel>, #tpu.dimension_semantics<arbitrary>], iteration_bounds = array<i64: 1, 1>, scalar_prefetch = 0 : i64, scratch_operands = 3 : i64, tpu.core_type = #tpu.core_type<tc>, window_params = [{transform_indices = @transform_0, window_bounds = array<i64: 16, 32>}, {transform_indices = @transform_1, window_bounds = array<i64: 32, 128>}, {transform_indices = @transform_2, window_bounds = array<i64: 16, 1>}, {transform_indices = @transform_3, window_bounds = array<i64: 16, 1>}]} {
    %c0_i32 = arith.constant 0 : i32
    %0 = arith.cmpi eq, %arg1, %c0_i32 : i32
    %1 = arith.extui %0 : i1 to i32
    %c0_i32_0 = arith.constant 0 : i32
    %2 = arith.cmpi ne, %1, %c0_i32_0 : i32
    scf.if %2 {
      %cst_24 = arith.constant -1.000000e+30 : f32
      %39 = vector.broadcast %cst_24 : f32 to vector<16x1xf32>
      %c0_25 = arith.constant 0 : index
      %c0_26 = arith.constant 0 : index
      %40 = vector.load %arg6[%c0_25, %c0_26] : memref<16x1xf32, #tpu.memory_space<vmem>>, vector<16x1xf32>
      tpu.vector_store %arg6[%c0_25, %c0_26], %39 {strides = array<i32>} : memref<16x1xf32, #tpu.memory_space<vmem>>, vector<16x1xf32>,
      %cst_27 = arith.constant 0.000000e+00 : f32
      %41 = vector.broadcast %cst_27 : f32 to vector<16x1xf32>
      %c0_28 = arith.constant 0 : index
      %c0_29 = arith.constant 0 : index
      %42 = vector.load %arg7[%c0_28, %c0_29] : memref<16x1xf32, #tpu.memory_space<vmem>>, vector<16x1xf32>
      tpu.vector_store %arg7[%c0_28, %c0_29], %41 {strides = array<i32>} : memref<16x1xf32, #tpu.memory_space<vmem>>, vector<16x1xf32>,
      %cst_30 = arith.constant 0.000000e+00 : f32
      %43 = vector.broadcast %cst_30 : f32 to vector<16x1xf32>
      %c0_31 = arith.constant 0 : index
      %c0_32 = arith.constant 0 : index
      %44 = vector.load %arg8[%c0_31, %c0_32] : memref<16x1xf32, #tpu.memory_space<vmem>>, vector<16x1xf32>
      tpu.vector_store %arg8[%c0_31, %c0_32], %43 {strides = array<i32>} : memref<16x1xf32, #tpu.memory_space<vmem>>, vector<16x1xf32>,
    } else {
    }
    %c0 = arith.constant 0 : index
    %c0_1 = arith.constant 0 : index
    %3 = vector.load %arg2[%c0, %c0_1] : memref<16x32xbf16, #tpu.memory_space<vmem>>, vector<16x32xbf16>
    %c0_2 = arith.constant 0 : index
    %c0_3 = arith.constant 0 : index
    %4 = vector.load %arg3[%c0_2, %c0_3] : memref<32x128xbf16, #tpu.memory_space<vmem>>, vector<32x128xbf16>
    %cst = arith.constant dense<0.000000e+00> : vector<16x128xf32>
    %5 = tpu.matmul %3, %4, %cst {dimension_numbers = #tpu.dot_dimension_numbers<[1], [0], [0], [1], [0, 0, 1, 1], [], []>} : vector<16x32xbf16>, vector<32x128xbf16>, vector<16x128xf32> -> vector<16x128xf32>
    %6 = tpu.iota {dimensions = array<i32: 1>} : vector<16x128xi32>
    %c0_4 = arith.constant 0 : index
    %c0_5 = arith.constant 0 : index
    %7 = vector.load %arg4[%c0_4, %c0_5] : memref<16x1xi32, #tpu.memory_space<vmem>>, vector<16x1xi32>
    %c128_i32 = arith.constant 128 : i32
    %8 = arith.muli %arg1, %c128_i32 : i32
    %9 = vector.broadcast %8 : i32 to vector<16x1xi32>
    %10 = arith.subi %7, %9 : vector<16x1xi32>
    %c0_6 = arith.constant 0 : index
    %c0_7 = arith.constant 0 : index
    %11 = vector.load %arg8[%c0_6, %c0_7] : memref<16x1xf32, #tpu.memory_space<vmem>>, vector<16x1xf32>
    %12 = vector.broadcast %10 : vector<16x1xi32> to vector<16x128xi32>
    %13 = arith.cmpi eq, %6, %12 : vector<16x128xi32>
    %cst_8 = arith.constant 0.000000e+00 : f32
    %14 = vector.broadcast %cst_8 : f32 to vector<16x128xf32>
    %15 = arith.select %13, %5, %14 : vector<16x128xi1>, vector<16x128xf32>
    %cst_9 = arith.constant dense<0.000000e+00> : vector<16xf32>
    %16 = vector.multi_reduction <add>, %15, %cst_9 [1] : vector<16x128xf32> to vector<16xf32>
    %17 = vector.shape_cast %16 : vector<16xf32> to vector<16x1xf32>
    %18 = arith.addf %11, %17 : vector<16x1xf32>
    %c0_10 = arith.constant 0 : index
    %c0_11 = arith.constant 0 : index
    %19 = vector.load %arg8[%c0_10, %c0_11] : memref<16x1xf32, #tpu.memory_space<vmem>>, vector<16x1xf32>
    tpu.vector_store %arg8[%c0_10, %c0_11], %18 {strides = array<i32>} : memref<16x1xf32, #tpu.memory_space<vmem>>, vector<16x1xf32>,
    %c0_12 = arith.constant 0 : index
    %c0_13 = arith.constant 0 : index
    %20 = vector.load %arg6[%c0_12, %c0_13] : memref<16x1xf32, #tpu.memory_space<vmem>>, vector<16x1xf32>
    %cst_14 = arith.constant dense<0xFF800000> : vector<16xf32>
    %21 = vector.multi_reduction <maximumf>, %5, %cst_14 [1] : vector<16x128xf32> to vector<16xf32>
    %22 = vector.shape_cast %21 : vector<16xf32> to vector<16x1xf32>
    %23 = arith.maximumf %20, %22 : vector<16x1xf32>
    %24 = arith.subf %20, %23 : vector<16x1xf32>
    %25 = math.exp %24 : vector<16x1xf32>
    %c0_15 = arith.constant 0 : index
    %c0_16 = arith.constant 0 : index
    %26 = vector.load %arg7[%c0_15, %c0_16] : memref<16x1xf32, #tpu.memory_space<vmem>>, vector<16x1xf32>
    %27 = arith.mulf %25, %26 : vector<16x1xf32>
    %28 = vector.broadcast %23 : vector<16x1xf32> to vector<16x128xf32>
    %29 = arith.subf %5, %28 : vector<16x128xf32>
    %30 = math.exp %29 : vector<16x128xf32>
    %cst_17 = arith.constant dense<0.000000e+00> : vector<16xf32>
    %31 = vector.multi_reduction <add>, %30, %cst_17 [1] : vector<16x128xf32> to vector<16xf32>
    %32 = vector.shape_cast %31 : vector<16xf32> to vector<16x1xf32>
    %33 = arith.addf %27, %32 : vector<16x1xf32>
    %c0_18 = arith.constant 0 : index
    %c0_19 = arith.constant 0 : index
    %34 = vector.load %arg7[%c0_18, %c0_19] : memref<16x1xf32, #tpu.memory_space<vmem>>, vector<16x1xf32>
    tpu.vector_store %arg7[%c0_18, %c0_19], %33 {strides = array<i32>} : memref<16x1xf32, #tpu.memory_space<vmem>>, vector<16x1xf32>,
    %c0_20 = arith.constant 0 : index
    %c0_21 = arith.constant 0 : index
    %35 = vector.load %arg6[%c0_20, %c0_21] : memref<16x1xf32, #tpu.memory_space<vmem>>, vector<16x1xf32>
    tpu.vector_store %arg6[%c0_20, %c0_21], %23 {strides = array<i32>} : memref<16x1xf32, #tpu.memory_space<vmem>>, vector<16x1xf32>,
    %c0_i32_22 = arith.constant 0 : i32
    %36 = arith.cmpi eq, %arg1, %c0_i32_22 : i32
    %37 = arith.extui %36 : i1 to i32
    %c0_i32_23 = arith.constant 0 : i32
    %38 = arith.cmpi ne, %37, %c0_i32_23 : i32
    scf.if %38 {
      %c0_24 = arith.constant 0 : index
      %c0_25 = arith.constant 0 : index
      %39 = vector.load %arg6[%c0_24, %c0_25] : memref<16x1xf32, #tpu.memory_space<vmem>>, vector<16x1xf32>
      %c0_26 = arith.constant 0 : index
      %c0_27 = arith.constant 0 : index
      %40 = vector.load %arg7[%c0_26, %c0_27] : memref<16x1xf32, #tpu.memory_space<vmem>>, vector<16x1xf32>
      %cst_28 = arith.constant 0.000000e+00 : f32
      %41 = vector.broadcast %cst_28 : f32 to vector<16x1xf32>
      %42 = arith.subf %41, %39 : vector<16x1xf32>
      %43 = math.exp %42 : vector<16x1xf32>
      %cst_29 = arith.constant 1.120000e+02 : f32
      %44 = vector.broadcast %cst_29 : f32 to vector<16x1xf32>
      %45 = arith.mulf %44, %43 : vector<16x1xf32>
      %46 = arith.subf %40, %45 : vector<16x1xf32>
      %cst_30 = arith.constant 1.000000e-30 : f32
      %47 = vector.broadcast %cst_30 : f32 to vector<16x1xf32>
      %48 = arith.maximumf %46, %47 : vector<16x1xf32>
      %49 = math.log %48 : vector<16x1xf32>
      %50 = arith.addf %39, %49 : vector<16x1xf32>
      %c0_31 = arith.constant 0 : index
      %c0_32 = arith.constant 0 : index
      %51 = vector.load %arg8[%c0_31, %c0_32] : memref<16x1xf32, #tpu.memory_space<vmem>>, vector<16x1xf32>
      %52 = arith.subf %50, %51 : vector<16x1xf32>
      %c0_33 = arith.constant 0 : index
      %c0_34 = arith.constant 0 : index
      %53 = vector.load %arg5[%c0_33, %c0_34] : memref<16x1xf32, #tpu.memory_space<vmem>>, vector<16x1xf32>
      tpu.vector_store %arg5[%c0_33, %c0_34], %52 {strides = array<i32>} : memref<16x1xf32, #tpu.memory_space<vmem>>, vector<16x1xf32>,
    } else {
    }
    return
  }
  func.func @transform_0(%arg0: i32, %arg1: i32) -> (i32, i32) {
    %c0_i32 = arith.constant 0 : i32
    %c0_i32_0 = arith.constant 0 : i32
    return %arg0, %c0_i32 : i32, i32
  }
  func.func @transform_1(%arg0: i32, %arg1: i32) -> (i32, i32) {
    %c0_i32 = arith.constant 0 : i32
    %c0_i32_0 = arith.constant 0 : i32
    return %c0_i32, %arg1 : i32, i32
  }
  func.func @transform_2(%arg0: i32, %arg1: i32) -> (i32, i32) {
    %c0_i32 = arith.constant 0 : i32
    %c0_i32_0 = arith.constant 0 : i32
    return %arg0, %c0_i32 : i32, i32
  }
  func.func @transform_3(%arg0: i32, %arg1: i32) -> (i32, i32) {
    %c0_i32 = arith.constant 0 : i32
    %c0_i32_0 = arith.constant 0 : i32
    return %arg0, %c0_i32 : i32, i32
  }
}

</mosaic_0001>

<bundles_post_ra>
// kernel: tpu_custom_call.1
= control target key start
LH: loop header
LB: loop body
LE: loop exit
PB: predicated region body
PF: predicated region fallthrough
CT: control target
= control target key end

     0   :  { %8 = vsyncpa [#allocation6], 0  ;;  %s284_s12 = smov [#allocation5]   ;;  %s355_s0 = inlined_call_operand.hbm [shape: bf16[16,32], index: 0, kind: input, shape index: {}]   ;;  %s356_s1 = inlined_call_operand.vmem [shape: bf16[32,128], index: 1, kind: input, shape index: {}]   ;;  %s357_s2 = inlined_call_operand.vmem [shape: s32[16,1], index: 2, kind: input, shape index: {}]   ;;  %s358_s3 = inlined_call_operand.vmem [shape: f32[16,1], index: 3, kind: output, shape index: {}]  }
   0x1   :  { %s14_s13 = sshll.u32 %s284_s12, 4  ;;  %s260_s16 = scalar_lea.hbm %s355_s0, 128  ;;  %s15_s13 = int_to_ptr.vmem [resolvable:$true] %s14_s13 }
   0x2   :  { %p261_p0 = scmp.ne.s32.totalorder %s355_s0, %s260_s16  ;;  %p264_p1 = scmp.lt.u32.totalorder %s260_s16, %s355_s0 }
   0x4   :  { %p266_p2 = pnand %p264_p1, %p261_p0 }
   0x6   :  { %269 = shalt.err (!%p266_p2)
}
   0x7   :  { %s270_s21 = scalar_lea.vmem %s15_s13, 128  ;;  %p275_p4 = scmp.lt.s32.totalorder %s15_s13, %s15_s13 }
   0x8   :  { %p271_p3 = scmp.ne.s32.totalorder %s15_s13, %s270_s21  ;;  %p276_p5 = scmp.lt.s32.totalorder %s270_s21, %s270_s21 }
   0xa   :  { %p277_p6 = por %p276_p5, %p275_p4 }
   0xc   :  { %p278_p7 = pnand %p277_p6, %p271_p3 }
   0xe   :  { %281 = shalt.err (!%p278_p7)
}
   0xf   :  { %s285_s22 = smov 64   ;;  %s286_s23 = smov 4  }
  0x10   :  { %20 = dma.hbm_to_vmem [thread:$0]  %s355_s0, 128, %s15_s13, [#allocation6], %s285_s22, %s285_s22, %s286_s23  }
  0x11   :  { %282 = dma.done.wait [#allocation6], 128  }
  0x12   :  { %283 = vsyncadd [#allocation6], 4294967168  ;;  %v287_v0 = vmov 0.0   ;;  %vm288_vm0 = vmmov 0   ;;  %v241_v1 = vld [vmem:[%s356_s1] sm:$0xff]   ;;  %v242_v2 = vld [vmem:[%s356_s1 + $0x8] sm:$0xff]   ;;  %v108_v18 = vlaneseq }
  0x13   :  { %224 = vmatprep.subr.bf16.mxu0 %v287_v0  ;;  %228 = vmatprep.mubr.msk.bf16.mxu0 %vm288_vm0, %v287_v0  ;;  %v243_v3 = vld [vmem:[#allocation5] sm:$0xff]   ;;  %vm63_vm1 = vcmask 261120   ;;  %v289_v4 = vmov 0   ;;  %vm33_vm2 = vcmask 7168   ;;  %v290_v5 = vmov -1e+30  }
  0x14   :  { %225 = vmatpush3.bf16.msra.mxu0 %v241_v1  ;;  %240 = vset.pattern.permute.xlu0 %v289_v4  ;;  %34 = vst.msk [vmem:[#allocation2] sm:$0xff] %vm33_vm2, %v290_v5  ;;  %35 = vst.msk [vmem:[#allocation2 + $0x8] sm:$0xff] %vm33_vm2, %v290_v5  ;;  %v110_v10 = vld [vmem:[%s357_s2] sm:$0xff]  ;;  %v111_v20 = vld [vmem:[%s357_s2 + $0x8] sm:$0xff]  ;;  %v109_v21 = vand.u32 127, %v108_v18 }
  0x15   :  { %226 = vmatprep.subr.bf16.mxu0 %v287_v0  ;;  %239 = vset.pattern.permute.xlu1 %v289_v4  ;;  %36 = vst.msk [vmem:[#allocation3] sm:$0xff] %vm33_vm2, %v287_v0  ;;  %37 = vst.msk [vmem:[#allocation3 + $0x8] sm:$0xff] %vm33_vm2, %v287_v0 }
  0x16   :  { %38 = vst.msk [vmem:[#allocation4] sm:$0xff] %vm33_vm2, %v287_v0  ;;  %39 = vst.msk [vmem:[#allocation4 + $0x8] sm:$0xff] %vm33_vm2, %v287_v0 }
  0x18   :  { %227 = vmatpush3.bf16.msra.mxu0 %v242_v2 }
  0x1b   :  { %229 = vmatmul.mubr.msk.bf16.vlgmr.msra.gmra.mrb[0].mxu0 %vm63_vm1, %v243_v3  ;;  %v137_v11 = vld [vmem:[#allocation2] sm:$0xff]  ;;  %v138_v14 = vld [vmem:[#allocation2 + $0x8] sm:$0xff] }
  0x1c   :  { %v151_v46 = vld [vmem:[#allocation3] sm:$0xff]  ;;  %v152_v50 = vld [vmem:[#allocation3 + $0x8] sm:$0xff] }
  0x1d   :  { %v116_v34 = vld [vmem:[#allocation4] sm:$0xff]  ;;  %v117_v56 = vld [vmem:[#allocation4 + $0x8] sm:$0xff] }
  0xee   :  { %v101_v6 = vpop.f32.mrb[0].mxu0 }
  0xef   :  { %139 = vmax.xlane.f32.xlu0 %v101_v6  ;;  %v230_v7 = vpop.f32.mrb[1].mxu0 }
  0xf0   :  { %v104_v8 = vpop.f32.mrb[2].mxu0 }
  0xf1   :  { %v231_v9 = vpop.f32.mrb[3].mxu0 }
  0xf3   :  { %141 = vmax.xlane.f32.xlu0 %v104_v8 }
 0x109   :  { %119 = vperm.xlu0 %240, %v110_v10  }
 0x17c   :  { %v140_v12 = vpop.xlane.xlu0 %139 }
 0x17d   :  { %v143_v13 = vmax.f32 %v137_v11, %v140_v12 }
 0x17f   :  { %v145_v15 = vsub.f32 %v137_v11, %v143_v13  ;;  %179 = vst.msk [vmem:[#allocation2] sm:$0xff] %vm33_vm2, %v143_v13  ;;  %157 = vperm.xlu1 %239, %v143_v13  }
 0x180   :  { %v142_v16 = vpop.xlane.xlu0 %141 }
 0x181   :  { %v144_v17 = vmax.f32 %v138_v14, %v142_v16  ;;  %v147_v37 = vmul.f32 1.442695, %v145_v15 }
 0x183   :  { %v146_v19 = vsub.f32 %v138_v14, %v144_v17  ;;  %180 = vst.msk [vmem:[#allocation2 + $0x8] sm:$0xff] %vm33_vm2, %v144_v17  ;;  %162 = vperm.xlu1 %239, %v144_v17  }
 0x185   :  { %v149_v39 = vmul.f32 1.442695, %v146_v19 }
 0x186   :  { %v184_v38 = vld [vmem:[#allocation2] sm:$0xff] }
 0x187   :  { %122 = vperm.xlu1 %239, %v111_v20   ;;  %v188_v40 = vsub.f32 0.0, %v184_v38 }
 0x188   :  { %v120_v22 = vpop.permute.xlu0 %119 }
 0x189   :  { %vm124_vm3 = vcmp.eq.s32.totalorder %v109_v21, %v120_v22  ;;  %v190_v42 = vmul.f32 1.442695, %v188_v40 }
 0x18a   :  { %v126_v23 = vsel %vm124_vm3, %v101_v6, 0.0  ;;  %v185_v41 = vld [vmem:[#allocation2 + $0x8] sm:$0xff] }
 0x18b   :  { %128 = vadd.xlane.f32.xlu0 %v126_v23  ;;  %v189_v43 = vsub.f32 0.0, %v185_v41 }
 0x18d   :  { %v192_v45 = vmul.f32 1.442695, %v189_v43 }
 0x1fe   :  { %v158_v24 = vpop.permute.xlu1 %157 }
 0x1ff   :  { %v165_v25 = vsub.f32 %v101_v6, %v158_v24 }
 0x201   :  { %v167_v26 = vmul.f32 1.442695, %v165_v25 }
 0x202   :  { %v163_v27 = vpop.permute.xlu1 %162 }
 0x203   :  { %244 = vpow2.f32 %v167_v26  ;;  %v166_v28 = vsub.f32 %v104_v8, %v163_v27 }
 0x205   :  { %v169_v29 = vmul.f32 1.442695, %v166_v28 }
 0x206   :  { %v123_v31 = vpop.permute.xlu1 %122 }
 0x207   :  { %246 = vpow2.f32 %v169_v29  ;;  %vm125_vm4 = vcmp.eq.s32.totalorder %v109_v21, %v123_v31 }
 0x208   :  { %v127_v33 = vsel %vm125_vm4, %v104_v8, 0.0  ;;  %248 = vpow2.f32 %v147_v37 }
 0x209   :  { %250 = vpow2.f32 %v149_v39 }
 0x20a   :  { %252 = vpow2.f32 %v190_v42 }
 0x20b   :  { %254 = vpow2.f32 %v192_v45 }
 0x20d   :  { %v245_v30 = vpop.eup %244 }
 0x20e   :  { %171 = vadd.xlane.f32.xlu1 %v245_v30 }
 0x211   :  { %v247_v32 = vpop.eup %246 }
 0x212   :  { %173 = vadd.xlane.f32.xlu1 %v247_v32  ;;  %v249_v44 = vpop.eup %248 }
 0x213   :  { %v153_v47 = vmul.f32 %v249_v44, %v151_v46  ;;  %v251_v48 = vpop.eup %250 }
 0x214   :  { %v154_v52 = vmul.f32 %v251_v48, %v152_v50  ;;  %v253_v55 = vpop.eup %252 }
 0x215   :  { %v194_v58 = vmul.f32 112.0, %v253_v55  ;;  %v255_v60 = vpop.eup %254 }
 0x216   :  { %130 = vadd.xlane.f32.xlu1 %v127_v33  ;;  %v195_v0 = vmul.f32 112.0, %v255_v60 }
 0x218   :  { %v129_v35 = vpop.xlane.xlu0 %128 }
 0x219   :  { %v132_v36 = vadd.f32 %v129_v35, %v116_v34 }
 0x21b   :  { %135 = vst.msk [vmem:[#allocation4] sm:$0xff] %vm33_vm2, %v132_v36 }
 0x222   :  { %v206_v8 = vld [vmem:[#allocation4] sm:$0xff] }
 0x29b   :  { %v172_v49 = vpop.xlane.xlu1 %171 }
 0x29c   :  { %v175_v51 = vadd.f32 %v172_v49, %v153_v47 }
 0x29e   :  { %177 = vst.msk [vmem:[#allocation3] sm:$0xff] %vm33_vm2, %v175_v51 }
 0x29f   :  { %v174_v53 = vpop.xlane.xlu1 %173 }
 0x2a0   :  { %v176_v54 = vadd.f32 %v174_v53, %v154_v52 }
 0x2a2   :  { %178 = vst.msk [vmem:[#allocation3 + $0x8] sm:$0xff] %vm33_vm2, %v176_v54 }
 0x2a3   :  { %v131_v57 = vpop.xlane.xlu1 %130 }
 0x2a4   :  { %v133_v59 = vadd.f32 %v131_v57, %v117_v56 }
 0x2a5   :  { %v186_v61 = vld [vmem:[#allocation3] sm:$0xff] }
 0x2a6   :  { %v196_v62 = vsub.f32 %v186_v61, %v194_v58  ;;  %136 = vst.msk [vmem:[#allocation4 + $0x8] sm:$0xff] %vm33_vm2, %v133_v59 }
 0x2a8   :  { %v198_v63 = vmax.f32 %v196_v62, 1e-30 }
 0x2a9   :  { %v187_v1 = vld [vmem:[#allocation3 + $0x8] sm:$0xff] }
 0x2aa   :  { %256 = vlog2.f32 %v198_v63  ;;  %v197_v2 = vsub.f32 %v187_v1, %v195_v0 }
 0x2ac   :  { %v199_v3 = vmax.f32 %v197_v2, 1e-30 }
 0x2ad   :  { %v207_v12 = vld [vmem:[#allocation4 + $0x8] sm:$0xff] }
 0x2ae   :  { %258 = vlog2.f32 %v199_v3 }
 0x2b4   :  { %v257_v4 = vpop.eup %256 }
 0x2b5   :  { %v201_v5 = vmul.f32 0.6931472, %v257_v4 }
 0x2b7   :  { %v204_v6 = vadd.f32 %v201_v5, %v184_v38 }
 0x2b8   :  { %v259_v7 = vpop.eup %258 }
 0x2b9   :  { %v208_v9 = vsub.f32 %v204_v6, %v206_v8  ;;  %v203_v10 = vmul.f32 0.6931472, %v259_v7 }
 0x2bb   :  { %210 = vst.msk [vmem:[%s358_s3] sm:$0xff] %vm33_vm2, %v208_v9  ;;  %v205_v11 = vadd.f32 %v203_v10, %v185_v41 }
 0x2bd   :  { %v209_v13 = vsub.f32 %v205_v11, %v207_v12 }
 0x2bf   :  { %211 = vst.msk [vmem:[%s358_s3 + $0x8] sm:$0xff] %vm33_vm2, %v209_v13 }
 0x2c0   :  { %216 = vsyncpa [#allocation6], 1 }

</bundles_post_ra>
